<compile_context>
chip_gen: v6e
topology: v6e:2x2x1
jax: 0.10.0
libtpu: 0.0.40
codegen_flags: <defaults>
</compile_context>

<pallas_src>
import jax
import jax.numpy as jnp
import numpy as np
from jax import lax
from jax.experimental import pallas as pl
from jax.experimental.pallas import tpu as pltpu

EPS = 1e-5  # torch.nn.InstanceNorm2d default eps


def _norm_affine(h, gamma, beta, *, relu):
    """Fused InstanceNorm + affine (+ optional ReLU) for one sample.

    h: (C, HW) f32; gamma/beta: (C, 1) f32.  One-pass statistics (both XLU
    reductions can overlap) and affine folded into per-channel scale/shift so
    the big tensor only sees h*h, h*scale and +shift.  f32 accumulation + eps
    keep the E[x^2]-mean^2 form safe at these magnitudes.
    """
    inv_n = 1.0 / h.shape[1]
    s1 = jnp.sum(h, axis=1, keepdims=True)
    s2 = jnp.sum(h * h, axis=1, keepdims=True)
    mean = s1 * inv_n
    var = s2 * inv_n - mean * mean                # biased var (matches torch)
    scale = gamma * lax.rsqrt(var + EPS)          # (C, 1) — tiny
    shift = beta - mean * scale                   # (C, 1) — tiny
    out = h * scale + shift
    return jnp.maximum(out, 0.0) if relu else out


def _make_kernel(H, W, C_in, C_pad, C_out, B_blk):
    HW = H * W
    # lane-roll amounts for the 9 taps in (ky, kx) row-major order
    shifts = []
    for ky in range(3):
        for kx in range(3):
            dy, dx = ky - 1, kx - 1
            shifts.append((-(dy * W + dx)) % HW)

    def kernel(x_ref, mask_ref, w1_ref, w2_ref, w3_ref, aff_ref, o_ref):
        # Grid-invariant operands: load once per step, hoisted out of the
        # per-sample loop.
        w1 = w1_ref[...]                    # (C_pad, C_in)
        w2 = w2_ref[...]                    # (C_pad, 9*C_pad)
        w3 = w3_ref[...]                    # (C_out, C_pad)
        mask = mask_ref[...]                # (9*C_pad, HW) in {0,1}
        aff = aff_ref[...]                  # (C_aff, 8): g1 b1 g2 b2 g3 b3 ..
        g1, b1 = aff[:C_pad, 0:1], aff[:C_pad, 1:2]
        g2, b2 = aff[:C_pad, 2:3], aff[:C_pad, 3:4]
        g3, b3 = aff[:C_out, 4:5], aff[:C_out, 5:6]

        @pl.loop(0, B_blk, unroll=(B_blk <= 2))
        def _(i):
            x = x_ref[i].astype(jnp.float32)          # (C_in, HW), upcast once

            # conv1: 1x1 conv == channel matmul (lane-dense output)
            h = jnp.dot(w1, x, preferred_element_type=jnp.float32)
            h = _norm_affine(h, g1, b1, relu=True)

            # conv2: 3x3, padding=1, as ONE im2col matmul.  Each tap is a lane
            # roll (XLU); C_pad == 8 rows per tap -> concat is free vreg
            # stacking; border zeroing is a single multiply by the constant mask.
            taps = [pltpu.roll(h, shift=s, axis=1) if s else h for s in shifts]
            slab = jnp.concatenate(taps, axis=0) * mask       # (9*C_pad, HW)
            h = jnp.dot(w2, slab, preferred_element_type=jnp.float32)
            h = _norm_affine(h, g2, b2, relu=True)

            # conv3: 1x1 conv to C_out channels
            h = jnp.dot(w3, h, preferred_element_type=jnp.float32)
            h = _norm_affine(h, g3, b3, relu=False)

            # residual + final ReLU (C_in == C_out)
            o_ref[i] = jnp.maximum(h + x, 0.0).astype(o_ref.dtype)

    return kernel


def _round_up(v, m):
    return (v + m - 1) // m * m


def _pick_batch_block(N, cap=8):
    """Largest divisor of N that is <= cap while keeping the grid length >= 2
    whenever N >= 2, so ("parallel",) can still shard the batch across v7x's
    two TensorCores.  On v5e/v6e (1 TC) this only affects overhead amortization."""
    best = 1
    for b in range(1, min(N, cap) + 1):
        if N % b == 0 and (N // b >= 2 or N == 1):
            best = b
    return best


def deep_block(x_nchw, params, *, io_dtype=jnp.float32, batch_block=None):
    """x_nchw: (N, C_in, H, W) (PyTorch-native NCHW). Returns NCHW output.

    io_dtype: dtype for x / out HBM traffic.  Use jnp.bfloat16 on v6e/v7x to
    halve DMA bytes; all arithmetic (MXU accumulation, norms, elementwise)
    stays f32, so it is also safe (just no traffic win worth it) on v5e.
    """
    N, C_in, H, W = x_nchw.shape
    C_mid = params["w1"].shape[0]
    C_out = 4 * C_mid
    assert C_in == C_out, "residual add requires channels == out_channels * 4"
    HW = H * W
    C_pad = max(8, _round_up(C_mid, 8))       # f32 sublane granule
    pc = C_pad - C_mid

    B_blk = batch_block if batch_block is not None else _pick_batch_block(N)
    assert N % B_blk == 0

    x_flat = x_nchw.reshape(N, C_in, HW).astype(io_dtype)

    # ---- host-side one-time weight / affine / mask prep (tiny) ----
    f32 = jnp.float32
    # conv1: (C_mid, C_in) zero-padded to (C_pad, C_in)
    w1m = jnp.pad(params["w1"].reshape(C_mid, C_in).astype(f32), ((0, pc), (0, 0)))
    # conv2 -> im2col layout: row o, column (ky*3+kx)*C_pad + i
    w2r = jnp.pad(params["w2"].astype(f32).transpose(2, 3, 0, 1),   # (ky,kx,o,i)
                  ((0, 0), (0, 0), (0, pc), (0, pc)))               # pad o,i -> C_pad
    w2m = w2r.transpose(2, 0, 1, 3).reshape(C_pad, 9 * C_pad)       # (o, tap*i)
    # conv3: (C_out, C_mid) zero-padded to (C_out, C_pad)
    w3m = jnp.pad(params["w3"].reshape(C_out, C_mid).astype(f32), ((0, 0), (0, pc)))

    # All six affine vectors packed into ONE small slab; padded channels get
    # gamma = beta = 0, which keeps padded rows exactly zero through every norm.
    C_aff = max(C_out, C_pad)
    aff = np.zeros((C_aff, 8), np.float32)
    aff[:C_mid, 0] = np.asarray(params["g1"], np.float32)
    aff[:C_mid, 1] = np.asarray(params["b1"], np.float32)
    aff[:C_mid, 2] = np.asarray(params["g2"], np.float32)
    aff[:C_mid, 3] = np.asarray(params["b2"], np.float32)
    aff[:C_out, 4] = np.asarray(params["g3"], np.float32)
    aff[:C_out, 5] = np.asarray(params["b3"], np.float32)
    aff = jnp.asarray(aff)

    # Border-validity masks for the 9 taps, hoisted out of the kernel and
    # pre-expanded over C_pad rows so the kernel applies one multiply.
    yy, xx = np.meshgrid(np.arange(H), np.arange(W), indexing="ij")
    yy = yy.reshape(-1)
    xx = xx.reshape(-1)
    rows = []
    for ky in range(3):
        for kx in range(3):
            dy, dx = ky - 1, kx - 1
            valid = ((yy + dy >= 0) & (yy + dy < H) &
                     (xx + dx >= 0) & (xx + dx < W)).astype(np.float32)
            rows.append(np.broadcast_to(valid, (C_pad, HW)))
    mask_full = jnp.asarray(np.concatenate(rows, axis=0))            # (9*C_pad, HW)

    kernel = _make_kernel(H, W, C_in, C_pad, C_out, B_blk)

    def rep(a):  # whole-array block, constant across the batch grid
        nd = a.ndim
        return pl.BlockSpec(a.shape, lambda b: (0,) * nd)

    # NOTE: whole-block-resident design.  Per step live VMEM ~ B_blk samples of
    # (C_in + C_pad + 9*C_pad + C_out) * HW * 4 B plus double-buffered I/O
    # blocks — ~100s of KiB here, far under the v7x 64 MiB (32 MiB scoped
    # default).  For much larger H*W this needs spatial tiling + two-pass norm,
    # and v7x hits that ceiling at ~half the H*W of v5e/v6e.
    out = pl.pallas_call(
        kernel,
        out_shape=jax.ShapeDtypeStruct((N, C_out, HW), io_dtype),
        grid_spec=pltpu.PrefetchScalarGridSpec(
            num_scalar_prefetch=0,
            grid=(N // B_blk,),                       # B_blk samples per step
            in_specs=[
                pl.BlockSpec((B_blk, C_in, HW), lambda b: (b, 0, 0)),   # x
                rep(mask_full), rep(w1m), rep(w2m), rep(w3m), rep(aff),
            ],
            out_specs=pl.BlockSpec((B_blk, C_out, HW), lambda b: (b, 0, 0)),
        ),
        compiler_params=pltpu.CompilerParams(
            dimension_semantics=("parallel",)),
    )(x_flat, mask_full, w1m, w2m, w3m, aff)

    return out.reshape(N, C_out, H, W)


def deep_block_ref(x_nchw, params):
    """Pure-JAX (XLA) reference of the PyTorch forward, NCHW, near-exact."""
    dn = ("NCHW", "OIHW", "NCHW")

    def inorm(h, g, b):
        mean = jnp.mean(h, axis=(2, 3), keepdims=True)
        var = jnp.mean((h - mean) ** 2, axis=(2, 3), keepdims=True)
        return (h - mean) * lax.rsqrt(var + EPS) * g.reshape(1, -1, 1, 1) \
            + b.reshape(1, -1, 1, 1)

    h = lax.conv_general_dilated(x_nchw, params["w1"], (1, 1), "VALID",
                                 dimension_numbers=dn,
                                 precision=lax.Precision.HIGHEST)
    h = jnp.maximum(inorm(h, params["g1"], params["b1"]), 0.0)
    h = lax.conv_general_dilated(h, params["w2"], (1, 1), [(1, 1), (1, 1)],
                                 dimension_numbers=dn,
                                 precision=lax.Precision.HIGHEST)
    h = jnp.maximum(inorm(h, params["g2"], params["b2"]), 0.0)
    h = lax.conv_general_dilated(h, params["w3"], (1, 1), "VALID",
                                 dimension_numbers=dn,
                                 precision=lax.Precision.HIGHEST)
    h = inorm(h, params["g3"], params["b3"]) + x_nchw
    return jnp.maximum(h, 0.0)


if __name__ == "__main__":
    key = jax.random.PRNGKey(0)
    N, H, W = 2, 16, 16
    C_mid = 4                    # out_channels
    C_in = 4 * C_mid             # channels (= out_channels * resize_factor)

    ks = jax.random.split(key, 10)
    params = {
        "w1": 0.1 * jax.random.normal(ks[0], (C_mid, C_in, 1, 1), jnp.float32),
        "g1": 1.0 + 0.1 * jax.random.normal(ks[1], (C_mid,), jnp.float32),
        "b1": 0.1 * jax.random.normal(ks[2], (C_mid,), jnp.float32),
        "w2": 0.1 * jax.random.normal(ks[3], (C_mid, C_mid, 3, 3), jnp.float32),
        "g2": 1.0 + 0.1 * jax.random.normal(ks[4], (C_mid,), jnp.float32),
        "b2": 0.1 * jax.random.normal(ks[5], (C_mid,), jnp.float32),
        "w3": 0.1 * jax.random.normal(ks[6], (4 * C_mid, C_mid, 1, 1), jnp.float32),
        "g3": 1.0 + 0.1 * jax.random.normal(ks[7], (4 * C_mid,), jnp.float32),
        "b3": 0.1 * jax.random.normal(ks[8], (4 * C_mid,), jnp.float32),
    }
    x = jax.random.normal(ks[9], (N, C_in, H, W), jnp.float32)

    # f32 I/O path (reference-accuracy check; kernel matmuls run at default
    # MXU precision vs HIGHEST in the reference, hence the 2e-2 tolerance).
    out = jax.block_until_ready(deep_block(x, params))
    ref = jax.block_until_ready(deep_block_ref(x, params))
    np.testing.assert_allclose(np.asarray(out), np.asarray(ref),
                               rtol=2e-2, atol=2e-2)

    # bf16-I/O variant (recommended on v6e/v7x: halves HBM traffic; compute
    # and norm statistics stay f32 so it is also v5e-safe).  Looser check.
    out_bf16 = jax.block_until_ready(
        deep_block(x, params, io_dtype=jnp.bfloat16)).astype(jnp.float32)
    np.testing.assert_allclose(np.asarray(out_bf16), np.asarray(ref),
                               rtol=1e-1, atol=1e-1)

    # TODO(synk): InstanceNorm2d(track_running_stats=True) running-mean/var EMA
    # buffer updates are a training-time side effect and are not produced here.
    print("KERNEL_OK")
</pallas_src>

<mosaic_0001>
module attributes {stable_mosaic.version = 11 : i64} {
  func.func @kernel(%arg0: i32, %arg1: memref<1x16x256xf32, #tpu.memory_space<vmem>>, %arg2: memref<72x256xf32, #tpu.memory_space<vmem>>, %arg3: memref<8x16xf32, #tpu.memory_space<vmem>>, %arg4: memref<8x72xf32, #tpu.memory_space<vmem>>, %arg5: memref<16x8xf32, #tpu.memory_space<vmem>>, %arg6: memref<16x8xf32, #tpu.memory_space<vmem>>, %arg7: memref<1x16x256xf32, #tpu.memory_space<vmem>>) attributes {dimension_semantics = [#tpu.dimension_semantics<parallel>], iteration_bounds = array<i64: 2>, scalar_prefetch = 0 : i64, scratch_operands = 0 : i64, tpu.core_type = #tpu.core_type<tc>, window_params = [{transform_indices = @transform_0, window_bounds = array<i64: 1, 16, 256>}, {pipeline_mode = #tpu.pipeline_mode<synchronous>, transform_indices = @transform_1, window_bounds = array<i64: 72, 256>}, {pipeline_mode = #tpu.pipeline_mode<synchronous>, transform_indices = @transform_2, window_bounds = array<i64: 8, 16>}, {pipeline_mode = #tpu.pipeline_mode<synchronous>, transform_indices = @transform_3, window_bounds = array<i64: 8, 72>}, {pipeline_mode = #tpu.pipeline_mode<synchronous>, transform_indices = @transform_4, window_bounds = array<i64: 16, 8>}, {pipeline_mode = #tpu.pipeline_mode<synchronous>, transform_indices = @transform_5, window_bounds = array<i64: 16, 8>}, {transform_indices = @transform_6, window_bounds = array<i64: 1, 16, 256>}]} {
    %c0 = arith.constant 0 : index
    %c0_0 = arith.constant 0 : index
    %0 = vector.load %arg3[%c0, %c0_0] : memref<8x16xf32, #tpu.memory_space<vmem>>, vector<8x16xf32>
    %c0_1 = arith.constant 0 : index
    %c0_2 = arith.constant 0 : index
    %1 = vector.load %arg4[%c0_1, %c0_2] : memref<8x72xf32, #tpu.memory_space<vmem>>, vector<8x72xf32>
    %c0_3 = arith.constant 0 : index
    %c0_4 = arith.constant 0 : index
    %2 = vector.load %arg5[%c0_3, %c0_4] : memref<16x8xf32, #tpu.memory_space<vmem>>, vector<16x8xf32>
    %c0_5 = arith.constant 0 : index
    %c0_6 = arith.constant 0 : index
    %3 = vector.load %arg2[%c0_5, %c0_6] : memref<72x256xf32, #tpu.memory_space<vmem>>, vector<72x256xf32>
    %c0_7 = arith.constant 0 : index
    %c0_8 = arith.constant 0 : index
    %4 = vector.load %arg6[%c0_7, %c0_8] : memref<16x8xf32, #tpu.memory_space<vmem>>, vector<16x8xf32>
    %5 = vector.extract_strided_slice %4 {offsets = [0, 0], sizes = [8, 1], strides = [1, 1]} : vector<16x8xf32> to vector<8x1xf32>
    %6 = vector.extract_strided_slice %4 {offsets = [0, 1], sizes = [8, 1], strides = [1, 1]} : vector<16x8xf32> to vector<8x1xf32>
    %7 = vector.extract_strided_slice %4 {offsets = [0, 2], sizes = [8, 1], strides = [1, 1]} : vector<16x8xf32> to vector<8x1xf32>
    %8 = vector.extract_strided_slice %4 {offsets = [0, 3], sizes = [8, 1], strides = [1, 1]} : vector<16x8xf32> to vector<8x1xf32>
    %9 = vector.extract_strided_slice %4 {offsets = [0, 4], sizes = [16, 1], strides = [1, 1]} : vector<16x8xf32> to vector<16x1xf32>
    %10 = vector.extract_strided_slice %4 {offsets = [0, 5], sizes = [16, 1], strides = [1, 1]} : vector<16x8xf32> to vector<16x1xf32>
    %c0_i32 = arith.constant 0 : i32
    %c1_i32 = arith.constant 1 : i32
    %11 = arith.muli %c0_i32, %c1_i32 : i32
    %c0_i32_9 = arith.constant 0 : i32
    %12 = arith.addi %c0_i32_9, %11 : i32
    %13 = arith.index_cast %12 : i32 to index
    %c0_10 = arith.constant 0 : index
    %c0_11 = arith.constant 0 : index
    %14 = vector.load %arg1[%13, %c0_10, %c0_11] : memref<1x16x256xf32, #tpu.memory_space<vmem>>, vector<1x16x256xf32>
    %15 = vector.shape_cast %14 : vector<1x16x256xf32> to vector<16x256xf32>
    %cst = arith.constant dense<0.000000e+00> : vector<8x256xf32>
    %16 = tpu.matmul %0, %15, %cst {dimension_numbers = #tpu.dot_dimension_numbers<[1], [0], [0], [1], [0, 0, 1, 1], [], []>} : vector<8x16xf32>, vector<16x256xf32>, vector<8x256xf32> -> vector<8x256xf32>
    %cst_12 = arith.constant dense<0.000000e+00> : vector<8xf32>
    %17 = vector.multi_reduction <add>, %16, %cst_12 [1] : vector<8x256xf32> to vector<8xf32>
    %18 = vector.shape_cast %17 : vector<8xf32> to vector<8x1xf32>
    %19 = arith.mulf %16, %16 : vector<8x256xf32>
    %cst_13 = arith.constant dense<0.000000e+00> : vector<8xf32>
    %20 = vector.multi_reduction <add>, %19, %cst_13 [1] : vector<8x256xf32> to vector<8xf32>
    %21 = vector.shape_cast %20 : vector<8xf32> to vector<8x1xf32>
    %cst_14 = arith.constant 3.906250e-03 : f32
    %22 = vector.broadcast %cst_14 : f32 to vector<8x1xf32>
    %23 = arith.mulf %18, %22 : vector<8x1xf32>
    %cst_15 = arith.constant 3.906250e-03 : f32
    %24 = vector.broadcast %cst_15 : f32 to vector<8x1xf32>
    %25 = arith.mulf %21, %24 : vector<8x1xf32>
    %26 = arith.mulf %23, %23 : vector<8x1xf32>
    %27 = arith.subf %25, %26 : vector<8x1xf32>
    %cst_16 = arith.constant 9.99999974E-6 : f32
    %28 = vector.broadcast %cst_16 : f32 to vector<8x1xf32>
    %29 = arith.addf %27, %28 : vector<8x1xf32>
    %30 = math.rsqrt %29 : vector<8x1xf32>
    %31 = arith.mulf %5, %30 : vector<8x1xf32>
    %32 = arith.mulf %23, %31 : vector<8x1xf32>
    %33 = arith.subf %6, %32 : vector<8x1xf32>
    %34 = vector.broadcast %31 : vector<8x1xf32> to vector<8x256xf32>
    %35 = arith.mulf %16, %34 : vector<8x256xf32>
    %36 = vector.broadcast %33 : vector<8x1xf32> to vector<8x256xf32>
    %37 = arith.addf %35, %36 : vector<8x256xf32>
    %cst_17 = arith.constant 0.000000e+00 : f32
    %38 = vector.broadcast %cst_17 : f32 to vector<8x256xf32>
    %39 = arith.maximumf %37, %38 : vector<8x256xf32>
    %c17_i32 = arith.constant 17 : i32
    %40 = tpu.dynamic_rotate %39 by %c17_i32 dim 1 : vector<8x256xf32>, i32 -> vector<8x256xf32>
    %c16_i32 = arith.constant 16 : i32
    %41 = tpu.dynamic_rotate %39 by %c16_i32 dim 1 : vector<8x256xf32>, i32 -> vector<8x256xf32>
    %c15_i32 = arith.constant 15 : i32
    %42 = tpu.dynamic_rotate %39 by %c15_i32 dim 1 : vector<8x256xf32>, i32 -> vector<8x256xf32>
    %c1_i32_18 = arith.constant 1 : i32
    %43 = tpu.dynamic_rotate %39 by %c1_i32_18 dim 1 : vector<8x256xf32>, i32 -> vector<8x256xf32>
    %c255_i32 = arith.constant 255 : i32
    %44 = tpu.dynamic_rotate %39 by %c255_i32 dim 1 : vector<8x256xf32>, i32 -> vector<8x256xf32>
    %c241_i32 = arith.constant 241 : i32
    %45 = tpu.dynamic_rotate %39 by %c241_i32 dim 1 : vector<8x256xf32>, i32 -> vector<8x256xf32>
    %c240_i32 = arith.constant 240 : i32
    %46 = tpu.dynamic_rotate %39 by %c240_i32 dim 1 : vector<8x256xf32>, i32 -> vector<8x256xf32>
    %c239_i32 = arith.constant 239 : i32
    %47 = tpu.dynamic_rotate %39 by %c239_i32 dim 1 : vector<8x256xf32>, i32 -> vector<8x256xf32>
    %48 = tpu.concatenate %40, %41, %42, %43, %39, %44, %45, %46, %47 in 0 : vector<8x256xf32>, vector<8x256xf32>, vector<8x256xf32>, vector<8x256xf32>, vector<8x256xf32>, vector<8x256xf32>, vector<8x256xf32>, vector<8x256xf32>, vector<8x256xf32> -> vector<72x256xf32>
    %49 = arith.mulf %48, %3 : vector<72x256xf32>
    %cst_19 = arith.constant dense<0.000000e+00> : vector<8x256xf32>
    %50 = tpu.matmul %1, %49, %cst_19 {dimension_numbers = #tpu.dot_dimension_numbers<[1], [0], [0], [1], [0, 0, 1, 1], [], []>} : vector<8x72xf32>, vector<72x256xf32>, vector<8x256xf32> -> vector<8x256xf32>
    %cst_20 = arith.constant dense<0.000000e+00> : vector<8xf32>
    %51 = vector.multi_reduction <add>, %50, %cst_20 [1] : vector<8x256xf32> to vector<8xf32>
    %52 = vector.shape_cast %51 : vector<8xf32> to vector<8x1xf32>
    %53 = arith.mulf %50, %50 : vector<8x256xf32>
    %cst_21 = arith.constant dense<0.000000e+00> : vector<8xf32>
    %54 = vector.multi_reduction <add>, %53, %cst_21 [1] : vector<8x256xf32> to vector<8xf32>
    %55 = vector.shape_cast %54 : vector<8xf32> to vector<8x1xf32>
    %cst_22 = arith.constant 3.906250e-03 : f32
    %56 = vector.broadcast %cst_22 : f32 to vector<8x1xf32>
    %57 = arith.mulf %52, %56 : vector<8x1xf32>
    %cst_23 = arith.constant 3.906250e-03 : f32
    %58 = vector.broadcast %cst_23 : f32 to vector<8x1xf32>
    %59 = arith.mulf %55, %58 : vector<8x1xf32>
    %60 = arith.mulf %57, %57 : vector<8x1xf32>
    %61 = arith.subf %59, %60 : vector<8x1xf32>
    %cst_24 = arith.constant 9.99999974E-6 : f32
    %62 = vector.broadcast %cst_24 : f32 to vector<8x1xf32>
    %63 = arith.addf %61, %62 : vector<8x1xf32>
    %64 = math.rsqrt %63 : vector<8x1xf32>
    %65 = arith.mulf %7, %64 : vector<8x1xf32>
    %66 = arith.mulf %57, %65 : vector<8x1xf32>
    %67 = arith.subf %8, %66 : vector<8x1xf32>
    %68 = vector.broadcast %65 : vector<8x1xf32> to vector<8x256xf32>
    %69 = arith.mulf %50, %68 : vector<8x256xf32>
    %70 = vector.broadcast %67 : vector<8x1xf32> to vector<8x256xf32>
    %71 = arith.addf %69, %70 : vector<8x256xf32>
    %cst_25 = arith.constant 0.000000e+00 : f32
    %72 = vector.broadcast %cst_25 : f32 to vector<8x256xf32>
    %73 = arith.maximumf %71, %72 : vector<8x256xf32>
    %cst_26 = arith.constant dense<0.000000e+00> : vector<16x256xf32>
    %74 = tpu.matmul %2, %73, %cst_26 {dimension_numbers = #tpu.dot_dimension_numbers<[1], [0], [0], [1], [0, 0, 1, 1], [], []>} : vector<16x8xf32>, vector<8x256xf32>, vector<16x256xf32> -> vector<16x256xf32>
    %cst_27 = arith.constant dense<0.000000e+00> : vector<16xf32>
    %75 = vector.multi_reduction <add>, %74, %cst_27 [1] : vector<16x256xf32> to vector<16xf32>
    %76 = vector.shape_cast %75 : vector<16xf32> to vector<16x1xf32>
    %77 = arith.mulf %74, %74 : vector<16x256xf32>
    %cst_28 = arith.constant dense<0.000000e+00> : vector<16xf32>
    %78 = vector.multi_reduction <add>, %77, %cst_28 [1] : vector<16x256xf32> to vector<16xf32>
    %79 = vector.shape_cast %78 : vector<16xf32> to vector<16x1xf32>
    %cst_29 = arith.constant 3.906250e-03 : f32
    %80 = vector.broadcast %cst_29 : f32 to vector<16x1xf32>
    %81 = arith.mulf %76, %80 : vector<16x1xf32>
    %cst_30 = arith.constant 3.906250e-03 : f32
    %82 = vector.broadcast %cst_30 : f32 to vector<16x1xf32>
    %83 = arith.mulf %79, %82 : vector<16x1xf32>
    %84 = arith.mulf %81, %81 : vector<16x1xf32>
    %85 = arith.subf %83, %84 : vector<16x1xf32>
    %cst_31 = arith.constant 9.99999974E-6 : f32
    %86 = vector.broadcast %cst_31 : f32 to vector<16x1xf32>
    %87 = arith.addf %85, %86 : vector<16x1xf32>
    %88 = math.rsqrt %87 : vector<16x1xf32>
    %89 = arith.mulf %9, %88 : vector<16x1xf32>
    %90 = arith.mulf %81, %89 : vector<16x1xf32>
    %91 = arith.subf %10, %90 : vector<16x1xf32>
    %92 = vector.broadcast %89 : vector<16x1xf32> to vector<16x256xf32>
    %93 = arith.mulf %74, %92 : vector<16x256xf32>
    %94 = vector.broadcast %91 : vector<16x1xf32> to vector<16x256xf32>
    %95 = arith.addf %93, %94 : vector<16x256xf32>
    %96 = arith.addf %95, %15 : vector<16x256xf32>
    %cst_32 = arith.constant 0.000000e+00 : f32
    %97 = vector.broadcast %cst_32 : f32 to vector<16x256xf32>
    %98 = arith.maximumf %96, %97 : vector<16x256xf32>
    %99 = arith.index_cast %12 : i32 to index
    %c0_33 = arith.constant 0 : index
    %c0_34 = arith.constant 0 : index
    %100 = vector.load %arg7[%99, %c0_33, %c0_34] : memref<1x16x256xf32, #tpu.memory_space<vmem>>, vector<1x16x256xf32>
    %101 = vector.shape_cast %100 : vector<1x16x256xf32> to vector<16x256xf32>
    %102 = vector.shape_cast %98 : vector<16x256xf32> to vector<1x16x256xf32>
    tpu.vector_store %arg7[%99, %c0_33, %c0_34], %102 {strides = array<i32>} : memref<1x16x256xf32, #tpu.memory_space<vmem>>, vector<1x16x256xf32>,
    %c1_i32_35 = arith.constant 1 : i32
    return
  }
  func.func @transform_0(%arg0: i32) -> (i32, i32, i32) {
    %c0_i32 = arith.constant 0 : i32
    %c0_i32_0 = arith.constant 0 : i32
    %c0_i32_1 = arith.constant 0 : i32
    return %arg0, %c0_i32, %c0_i32_0 : i32, i32, i32
  }
  func.func @transform_1(%arg0: i32) -> (i32, i32) {
    %c0_i32 = arith.constant 0 : i32
    %c0_i32_0 = arith.constant 0 : i32
    %c0_i32_1 = arith.constant 0 : i32
    return %c0_i32, %c0_i32_0 : i32, i32
  }
  func.func @transform_2(%arg0: i32) -> (i32, i32) {
    %c0_i32 = arith.constant 0 : i32
    %c0_i32_0 = arith.constant 0 : i32
    %c0_i32_1 = arith.constant 0 : i32
    return %c0_i32, %c0_i32_0 : i32, i32
  }
  func.func @transform_3(%arg0: i32) -> (i32, i32) {
    %c0_i32 = arith.constant 0 : i32
    %c0_i32_0 = arith.constant 0 : i32
    %c0_i32_1 = arith.constant 0 : i32
    return %c0_i32, %c0_i32_0 : i32, i32
  }
  func.func @transform_4(%arg0: i32) -> (i32, i32) {
    %c0_i32 = arith.constant 0 : i32
    %c0_i32_0 = arith.constant 0 : i32
    %c0_i32_1 = arith.constant 0 : i32
    return %c0_i32, %c0_i32_0 : i32, i32
  }
  func.func @transform_5(%arg0: i32) -> (i32, i32) {
    %c0_i32 = arith.constant 0 : i32
    %c0_i32_0 = arith.constant 0 : i32
    %c0_i32_1 = arith.constant 0 : i32
    return %c0_i32, %c0_i32_0 : i32, i32
  }
  func.func @transform_6(%arg0: i32) -> (i32, i32, i32) {
    %c0_i32 = arith.constant 0 : i32
    %c0_i32_0 = arith.constant 0 : i32
    %c0_i32_1 = arith.constant 0 : i32
    return %arg0, %c0_i32, %c0_i32_0 : i32, i32, i32
  }
}

</mosaic_0001>

<bundles_post_ra>
// kernel: tpu_custom_call.1
= control target key start
LH: loop header
LB: loop body
LE: loop exit
PB: predicated region body
PF: predicated region fallthrough
CT: control target
= control target key end

     0   :  { %11 = vsyncpa [#allocation3], 0  ;;  %s1442_s0 = inlined_call_operand.hbm [shape: f32[2,16,256], index: 0, kind: input, shape index: {}]   ;;  %s1443_s1 = inlined_call_operand.hbm [shape: f32[72,256], index: 1, kind: input, shape index: {}]   ;;  %s1444_s2 = inlined_call_operand.vmem [shape: f32[8,16], index: 2, kind: input, shape index: {}]   ;;  %s1445_s3 = inlined_call_operand.vmem [shape: f32[8,72], index: 3, kind: input, shape index: {}]   ;;  %s1446_s4 = inlined_call_operand.vmem [shape: f32[16,8], index: 4, kind: input, shape index: {}]   ;;  %s1447_s5 = inlined_call_operand.vmem [shape: f32[16,8], index: 5, kind: input, shape index: {}]   ;;  %s1448_s6 = inlined_call_operand.hbm [shape: f32[2,16,256], index: 6, kind: output, shape index: {}]  }
   0x1   :  { %13 = vsyncpa [#allocation3 + $0x1], 0 }
   0x2   :  { %14 = vsyncpa [#allocation6], 0 }
   0x3   :  { %15 = vsyncpa [#allocation4], 0 }
   0x4   :  { %17 = vsyncpa [#allocation4 + $0x1], 0  ;;  %s1168_s21 = smov 0   ;;  %s1170_s22 = smov 0  }
   0x5   :  { %s1172_s23 = smov 0   ;;  %s1174_s24 = smov 0  }
   0x6 LB: > { %s1189_s25 = sadd.s32 4294967295, %s1110_s24   ;;  %s876_s26 = sadd.s32 4294967294, %s1110_s24   ;;  %s1110_s24 = sphi %s1174_s24, %s1474_s24   ;;  %s1106_s23 = sphi %s1172_s23, %s1473_s23   ;;  %s1102_s22 = sphi %s1170_s22, %s1472_s22   ;;  %s1098_s21 = sphi %s1168_s21, %s1471_s21  }
   0x7   : > { %p43_p0 = scmp.ne.s32.totalorder %s1102_s22, %s1098_s21  ;;  %p1449_p1 = scmp.eq.s32.totalorder %s1189_s25, 0 }
   0x8   : > { %p178_p3 = scmp.eq.s32.totalorder %s876_s26, 1  ;;  %p877_p5 = scmp.ge.s32.totalorder %s1110_s24, 1 }
   0x9   : > { %p1198_p4 = por %p1449_p1, %p43_p0  ;;  %p185_p7 = scmp.lt.s32.totalorder %s1110_s24, 3 }
   0xa   : > { %p1203_p6 = por %p178_p3, %p43_p0  ;;  %s1112_s30 = smov [#allocation5]  }
   0xb   : > { %s1455_s27 = scalar_select %p1198_p4, 1, 0 }
   0xc   : > { %s1456_s28 = scalar_select %p1203_p6, 1, 0 }
   0xd   : > { %p1208_p8 = pnand %p877_p5, %p185_p7  ;;  %s197_s7 = sshll.u32 %s1112_s30, 4  ;;  %s198_s7 = int_to_ptr.vmem [resolvable:$true] %s197_s7 }
   0xe   : > { %s1222_s9 = sadd.s32 1, %s1110_s24   ;;  %s30_s10 = sadd.s32 1, %s1106_s23 }
   0xf   : > { %s1457_s29 = scalar_select %p1208_p8, 1, 0 }
  0x10   : > { %p906_p9 = pneg %p1208_p8  ;;  %s27_s11 = ssub.s32 %s1110_s24, %s1222_s9 }
  0x11   : > { %s999_s12 = scalar_lea.vmem %s198_s7, 2304  ;;  %p1007_p5 = scmp.lt.s32.totalorder %s198_s7, %s198_s7 }
  0x12   : > { %p1217_p11 = pnand %p906_p9, %p1449_p1  ;;  %p1000_p13 = scmp.ne.s32.totalorder %s198_s7, %s999_s12 }
  0x13   : > { %p1008_p7 = scmp.lt.s32.totalorder %s999_s12, %s999_s12 }
  0x14   : > { %p990_p12 = pneg %p1217_p11 }
  0x15   : > { %p1009_p10 = por %p1008_p7, %p1007_p5 }
  0x16   : > { %p1002_p0 = pnand %p1000_p13, %p990_p12 }
  0x18   : > { %p1003_p3 = pneg %p1002_p0 }
  0x1a   : > { %p1010_p2 = pnand %p1009_p10, %p1003_p3 }
  0x1c   : > { %1013 = shalt.err (!%p1010_p2)
}
  0x1d   : > { %s1450_s13 = smov 256   ;;  %s1451_s14 = smov 16  }
  0x1e   : > { %909 = dma.hbm_to_vmem [thread:$0]  (!%p1217_p11), %s1443_s1, 2304, %s198_s7, [#allocation6], %s1450_s13, %s1450_s13, %s1451_s14  }
  0x1f   : > { %p28_p2 = scmp.eq.s32.totalorder %s27_s11, 0  ;;  %p37_p9 = scmp.ne.s32.totalorder %s1106_s23, %s1102_s22 }
  0x20   : > { %p38_p10 = scmp.eq.s32.totalorder %s1110_s24, 0  ;;  %p919_p12 = scmp.lt.s32.totalorder %s1110_s24, 2 }
  0x21   : > { %s1242_s17 = scalar_select %p28_p2, %s1106_s23, %s30_s10  }
  0x22   : > { %p39_p13 = por %p38_p10, %p37_p9  ;;  %p1459_p0 = scmp.eq.s32.totalorder %s1189_s25, 1 }
  0x23   : > { %s223_s19 = sand.u32 1, %s1106_s23   ;;  %s896_s20 = sshll.u32 %s1110_s24, 9 }
  0x24   : > { %p1246_p3 = por %p1459_p0, %p37_p9  ;;  %s880_s26 = sshll.u32 %s223_s19, 5 }
  0x25   : > { %s1255_s12 = scalar_lea.hbm %s1442_s0, %s896_s20  ;;  %s227_s7 = scalar_lea.vmem [#allocation2], %s880_s26 }
  0x26   : > { %s1460_s18 = scalar_select %p1246_p3, 1, 0 }
  0x27   : > { %s234_s10 = sshll.u32 %s227_s7, 4  ;;  %p1257_p11 = pnand %p919_p12, %p39_p13  ;;  %s1261_s10 = int_to_ptr.vmem [resolvable:$true] %s234_s10 }
  0x28   : > { %s1263_s15 = scalar_lea.sflag [#allocation3], %s223_s19  ;;  %s1014_s16 = scalar_lea.hbm %s1255_s12, 512 }
  0x29   : > { %p1015_p5 = scmp.ne.s32.totalorder %s1255_s12, %s1014_s16  ;;  %p1016_p7 = pneg %p1257_p11 }
  0x2a   : > { %s1019_s26 = scalar_lea.hbm %s1442_s0, 1024  ;;  %p1020_p10 = scmp.lt.s32.totalorder %s1255_s12, %s1442_s0 }
  0x2b   : > { %p1017_p2 = pnand %p1016_p7, %p1015_p5  ;;  %p1021_p12 = scmp.lt.s32.totalorder %s1019_s26, %s1014_s16 }
  0x2d   : > { %p1018_p9 = pneg %p1017_p2  ;;  %p1022_p13 = por %p1021_p12, %p1020_p10 }
  0x2f   : > { %p1023_p0 = pnand %p1022_p13, %p1018_p9 }
  0x31   : > { %1026 = shalt.err (!%p1023_p0)
}
  0x32   : > { %s1027_s19 = scalar_lea.vmem %s1261_s10, 512  ;;  %s1115_s13 = smov [#allocation2]  }
  0x33   : > { %p1028_p1 = scmp.ne.s32.totalorder %s1261_s10, %s1027_s19  ;;  %s1032_s14 = sshll.u32 %s1115_s13, 4  ;;  %s1033_s14 = int_to_ptr.vmem [resolvable:$false] %s1032_s14 }
  0x34   : > { %s1034_s20 = scalar_lea.vmem %s1033_s14, 1024  ;;  %p1035_p2 = scmp.lt.s32.totalorder %s1261_s10, %s1033_s14 }
  0x35   : > { %p1030_p6 = pnand %p1028_p1, %p1016_p7  ;;  %p1036_p3 = scmp.lt.s32.totalorder %s1034_s20, %s1027_s19 }
  0x37   : > { %p1031_p5 = pneg %p1030_p6  ;;  %p1037_p4 = por %p1036_p3, %p1035_p2 }
  0x39   : > { %p1038_p8 = pnand %p1037_p4, %p1031_p5 }
  0x3b   : > { %1041 = shalt.err (!%p1038_p8)
}
  0x3c   : > { %s1462_s16 = smov 16   ;;  %s1463_s30 = smov 256  }
  0x3d   : > { %913 = dma.hbm_to_vmem [thread:$0]  (!%p1257_p11), %s1255_s12, 512, %s1261_s10, %s1263_s15, %s1463_s30, %s1463_s30, %s1462_s16  }
  0x3e   : > { %p1464_p1 = scmp.ne.s32.totalorder %s1457_s29, 0 }
  0x3f   : > { %s1290_s13 = sand.u32 (!%p1464_p1), 1, %s1102_s22   ;;  %p1465_p4 = scmp.ne.s32.totalorder (!%p1464_p1), %s1455_s27, 0 }
  0x40   : > { %246 = sbr.rel (%p1464_p1) target bundleno = 2091 (0x82b), region = 44  ;;  %s884_s14 = sshll.u32 (!%p1464_p1), %s1290_s13, 5 }
  0x41   : > { %s249_s26 = scalar_lea.sflag (!%p1464_p1), [#allocation3], %s1290_s13  ;;  %s252_s11 = scalar_lea.vmem (!%p1464_p1), [#allocation2], %s884_s14 }
  0x45   : > { %1085 = dma.done.wait (%p1465_p4), %s249_s26, 512  }
  0x46   : > { %1087 = vsyncadd (%p1465_p4), %s249_s26, 4294966784  ;;  %p1466_p6 = scmp.eq.s32.totalorder %s1189_s25, 0 }
  0x48   : > { %1089 = dma.done.wait (%p1466_p6), [#allocation6], 2304   ;;  %p1467_p8 = pmov %p1466_p6 }
  0x49   : > { %v1116_v0 = vmov 0.0   ;;  %v1306_v1 = vld [vmem:[%s252_s11 + $0x18] sm:$0xff]  ;;  %v1308_v2 = vld [vmem:[%s252_s11 + $0x10] sm:$0xff]  ;;  %v1310_v3 = vld [vmem:[%s252_s11 + $0x8] sm:$0xff]  ;;  %vm313_vm0 = vcmask 130048   ;;  %v1117_v12 = vmov 0   ;;  %v429_v35 = vlaneseq }
  0x4a   : > { %1091 = vsyncadd (%p1467_p8), [#allocation6], 4294964992  ;;  %381 = vmatprep.mubr.f32.mxu0 %v1116_v0  ;;  %569 = vmatprep.mubr.f32.mxu1 %v1116_v0  ;;  %v1313_v4 = vld [vmem:[%s252_s11] sm:$0xff]  ;;  %v1118_v20 = vmov 1   ;;  %s1119_s15 = smov 1   ;;  %s1120_s8 = smov 15  }
  0x4b   : > { %345 = vmatprep.subr.mxu0 %v1306_v1  ;;  %v285_v5 = vld [vmem:[%s1444_s2] sm:$0xff]  ;;  %973 = vset.pattern.permute.xlu1 %v1117_v12  ;;  %s1121_s7 = smov 111   ;;  %s1122_s19 = smov 16   ;;  %v1354_v36 = vand.u32 127, %v429_v35  ;;  %v306_v38 = vld [vmem:[#allocation5 + $0x88] sm:$0xff]  ;;  %v303_v46 = vld [vmem:[#allocation5 + $0x70] sm:$0xff] }
  0x4c   : > { %346 = vmatpush1.msra.mxu0 %v1308_v2  ;;  %974 = vset.pattern.permute.xlu0 %v1118_v20  ;;  %v1325_v21 = vld [vmem:[%s1447_s5] sm:$0xff]  ;;  %s1123_s20 = smov 17   ;;  %s1124_s16 = smov 112   ;;  %v304_v47 = vld [vmem:[#allocation5 + $0x78] sm:$0xff]  ;;  %v302_v55 = vld [vmem:[#allocation5 + $0x68] sm:$0xff]  ;;  %vm501_vm9 = vcmask 588800  }
  0x4d   : > { %347 = vmatprep.subr.mxu0 %v1310_v3  ;;  %s1125_s30 = smov 113   ;;  %s1126_s26 = smov 127   ;;  %vm480_vm1 = vcmp.lt.s32.totalorder %v1354_v36, 111  ;;  %v305_v39 = vld [vmem:[#allocation5 + $0x80] sm:$0xff]  ;;  %vm473_vm2 = vcmp.lt.s32.totalorder %v1354_v36, 112  ;;  %vm466_vm3 = vcmp.lt.s32.totalorder %v1354_v36, 113 }
  0x4e   : > { %348 = vmatpush1.msra.mxu0 %v1313_v4  ;;  %v301_v54 = vld [vmem:[#allocation5 + $0x60] sm:$0xff]  ;;  %vm459_vm4 = vcmp.lt.s32.totalorder %v1354_v36, 127  ;;  %v299_v62 = vld [vmem:[#allocation5 + $0x50] sm:$0xff]  ;;  %v300_v63 = vld [vmem:[#allocation5 + $0x58] sm:$0xff]  ;;  %vm452_vm5 = vcmp.lt.s32.totalorder %v1354_v36, 1  ;;  %vm445_vm6 = vcmp.lt.s32.totalorder %v1354_v36, 15 }
  0x4f   : > { %887 = vmatmul.mubr.msk.f32.vlgmr.msra.gmra.mxu0 %vm313_vm0, %v285_v5  ;;  %vm438_vm7 = vcmp.lt.s32.totalorder %v1354_v36, 16  ;;  %vm431_vm8 = vcmp.lt.s32.totalorder %v1354_v36, 17  ;;  %vm613_vm10 = vcmask 64512   ;;  %p1468_p11 = scmp.ne.s32.totalorder %s1460_s18, 0  ;;  %s1131_s29 = smov [#allocation7]  }
  0x50   : > { %684 = vmatprep.mubr.f32.mxu0 %v1116_v0  ;;  %s1046_s12 = sshll.u32 %s1131_s29, 4  ;;  %s1047_s12 = int_to_ptr.vmem [resolvable:$false] %s1046_s12 }
  0x51   : > { %s1048_s10 = scalar_lea.vmem %s1047_s12, 1024 }
 0x10f   : > { %v383_v6 = vpop.f32.mrf.mxu0 }
 0x110   : > { %v391_v10 = vmul.f32 %v383_v6, %v383_v6 }
 0x111   : > { %v385_v7 = vpop.f32.mrf.mxu0 }
 0x112   : > { %v388_v8 = vadd.f32 %v385_v7, %v383_v6  ;;  %v392_v9 = vmul.f32 %v385_v7, %v385_v7 }
 0x114   : > { %389 = vadd.xlane.f32.xlu0 %v388_v8  ;;  %v393_v11 = vadd.f32 %v392_v9, %v391_v10  ;;  %v298_v8 = vld [vmem:[#allocation5 + $0x48] sm:$0xff] }
 0x118   : > { %394 = vadd.xlane.f32.xlu0 %v393_v11  ;;  %v297_v11 = vld [vmem:[#allocation5 + $0x40] sm:$0xff] }
 0x19d   : > { %v390_v13 = vpop.xlane.xlu0 %389 }
 0x19e   : > { %v396_v14 = vmul.f32 0.00390625, %v390_v13 }
 0x1a0   : > { %v398_v16 = vmul.f32 %v396_v14, %v396_v14 }
 0x1a1   : > { %v395_v15 = vpop.xlane.xlu0 %394 }
 0x1a2   : > { %v397_v17 = vmul.f32 0.00390625, %v395_v15  ;;  %v295_v15 = vld [vmem:[#allocation5 + $0x30] sm:$0xff] }
 0x1a4   : > { %v399_v18 = vsub.f32 %v397_v17, %v398_v16  ;;  %v296_v16 = vld [vmem:[#allocation5 + $0x38] sm:$0xff] }
 0x1a6   : > { %v400_v19 = vadd.f32 1e-05, %v399_v18 }
 0x1a8   : > { %980 = vrsqrt.f32 %v400_v19 }
 0x1b5   : > { %v981_v22 = vpop.eup %980 }
 0x1b6   : > { %v402_v23 = vmul.f32 %v981_v22, %v1325_v21 }
 0x1b8   : > { %v403_v24 = vmul.f32 %v402_v23, %v396_v14 }
 0x1ba   : > { %405 = vrot.lane.b32.xlu1 %v403_v24, %s1119_s15  ;;  %v293_v24 = vld [vmem:[#allocation5 + $0x20] sm:$0xff] }
 0x1be   : > { %411 = vperm.xlu1 %973, %v402_v23  }
 0x22c   : > { %v406_v25 = vpop.permute.xlu1 %405 }
 0x22d   : > { %v408_v26 = vsub.f32 %v1325_v21, %v406_v25  ;;  %v294_v25 = vld [vmem:[#allocation5 + $0x28] sm:$0xff] }
 0x22f   : > { %418 = vperm.xlu0 %974, %v408_v26  }
 0x239   : > { %v412_v27 = vpop.permute.xlu1 %411 }
 0x23a   : > { %v414_v28 = vmul.f32 %v412_v27, %v383_v6  ;;  %v415_v29 = vmul.f32 %v412_v27, %v385_v7 }
 0x2aa   : > { %v419_v30 = vpop.permute.xlu0 %418 }
 0x2ab   : > { %v421_v31 = vadd.f32 %v419_v30, %v414_v28  ;;  %v422_v32 = vadd.f32 %v419_v30, %v415_v29 }
 0x2ad   : > { %v1330_v33 = vmax.f32 %v421_v31, 0.0  ;;  %v1332_v34 = vmax.f32 %v422_v32, 0.0  ;;  %v291_v32 = vld [vmem:[#allocation5 + $0x10] sm:$0xff] }
 0x2af   : > { %443 = vrot.lane.b32.xlu0 %v1332_v34, %s1120_s8  ;;  %476 = vrot.lane.b32.xlu1 %v1330_v33, %s1121_s7  ;;  %v492_v13 = vmul.f32 %v1332_v34, %v298_v8  ;;  %v491_v14 = vmul.f32 %v1330_v33, %v297_v11 }
 0x2b3   : > { %436 = vrot.lane.b32.xlu0 %v1332_v34, %s1122_s19  ;;  %478 = vrot.lane.b32.xlu1 %v1332_v34, %s1121_s7 }
 0x2b7   : > { %427 = vrot.lane.b32.xlu0 %v1332_v34, %s1123_s20  ;;  %469 = vrot.lane.b32.xlu1 %v1330_v33, %s1124_s16 }
 0x2bb   : > { %471 = vrot.lane.b32.xlu1 %v1332_v34, %s1124_s16 }
 0x2bf   : > { %462 = vrot.lane.b32.xlu1 %v1330_v33, %s1125_s30 }
 0x2c3   : > { %464 = vrot.lane.b32.xlu1 %v1332_v34, %s1125_s30  ;;  %s897_s30 = sshll.u32 %s1189_s25, 9  ;;  %s780_s25 = scalar_lea.sflag [#allocation4], %s1290_s13 }
 0x2c4   : > { %s1398_s11 = scalar_lea.hbm %s1448_s6, %s897_s30 }
 0x2c7   : > { %455 = vrot.lane.b32.xlu1 %v1330_v33, %s1126_s26 }
 0x2cb   : > { %457 = vrot.lane.b32.xlu1 %v1332_v34, %s1126_s26 }
 0x2cf   : > { %448 = vrot.lane.b32.xlu1 %v1330_v33, %s1119_s15 }
 0x2d3   : > { %450 = vrot.lane.b32.xlu1 %v1332_v34, %s1119_s15 }
 0x2d7   : > { %441 = vrot.lane.b32.xlu1 %v1330_v33, %s1120_s8 }
 0x2db   : > { %434 = vrot.lane.b32.xlu1 %v1330_v33, %s1122_s19 }
 0x2df   : > { %425 = vrot.lane.b32.xlu1 %v1330_v33, %s1123_s20  ;;  %v292_v33 = vld [vmem:[#allocation5 + $0x18] sm:$0xff] }
 0x321   : > { %v477_v37 = vpop.permute.xlu1 %476  ;;  %v444_v17 = vpop.permute.xlu0 %443 }
 0x325   : > { %v479_v40 = vpop.permute.xlu1 %478  ;;  %v437_v29 = vpop.permute.xlu0 %436 }
 0x326   : > { %v481_v41 = vsel %vm480_vm1, %v477_v37, %v479_v40  ;;  %v482_v42 = vsel %vm480_vm1, %v479_v40, %v477_v37  ;;  %v289_v40 = vld [vmem:[#allocation5] sm:$0xff] }
 0x327   : > { %v500_v43 = vmul.f32 %v482_v42, %v306_v38  ;;  %v499_v44 = vmul.f32 %v481_v41, %v305_v39  ;;  %v290_v41 = vld [vmem:[#allocation5 + $0x8] sm:$0xff] }
 0x329   : > { %519 = vmatprep.subr.mxu1 %v500_v43  ;;  %v470_v45 = vpop.permute.xlu1 %469  ;;  %v428_v42 = vpop.permute.xlu0 %427 }
 0x32a   : > { %520 = vmatpush1.msra.mxu1 %v499_v44 }
 0x32d   : > { %v472_v48 = vpop.permute.xlu1 %471 }
 0x32e   : > { %v474_v49 = vsel %vm473_vm2, %v470_v45, %v472_v48  ;;  %v475_v50 = vsel %vm473_vm2, %v472_v48, %v470_v45  ;;  %v286_v48 = vld [vmem:[%s1445_s3] sm:$0xff] }
 0x32f   : > { %v497_v51 = vmul.f32 %v474_v49, %v303_v46  ;;  %v498_v52 = vmul.f32 %v475_v50, %v304_v47 }
 0x331   : > { %521 = vmatprep.subr.mxu1 %v498_v52  ;;  %v463_v53 = vpop.permute.xlu1 %462 }
 0x332   : > { %522 = vmatpush1.msra.mxu1 %v497_v51 }
 0x335   : > { %v465_v56 = vpop.permute.xlu1 %464 }
 0x336   : > { %v467_v57 = vsel %vm466_vm3, %v463_v53, %v465_v56  ;;  %v468_v58 = vsel %vm466_vm3, %v465_v56, %v463_v53 }
 0x337   : > { %v495_v59 = vmul.f32 %v467_v57, %v301_v54  ;;  %v496_v60 = vmul.f32 %v468_v58, %v302_v55  ;;  %v1127_v54 = vmov 2  }
 0x338   : > { %975 = vset.pattern.permute.xlu1 %v1127_v54 }
 0x339   : > { %523 = vmatprep.subr.mxu1 %v496_v60  ;;  %v456_v61 = vpop.permute.xlu1 %455 }
 0x33a   : > { %524 = vmatpush1.msra.mxu1 %v495_v59 }
 0x33d   : > { %v458_v5 = vpop.permute.xlu1 %457 }
 0x33e   : > { %v460_v6 = vsel %vm459_vm4, %v456_v61, %v458_v5  ;;  %v461_v7 = vsel %vm459_vm4, %v458_v5, %v456_v61 }
 0x33f   : > { %v493_v9 = vmul.f32 %v460_v6, %v299_v62  ;;  %v494_v10 = vmul.f32 %v461_v7, %v300_v63  ;;  %v1128_v6 = vmov 3  }
 0x341   : > { %525 = vmatprep.subr.mxu1 %v494_v10  ;;  %v449_v12 = vpop.permute.xlu1 %448 }
 0x342   : > { %526 = vmatpush1.msra.mxu1 %v493_v9 }
 0x343   : > { %527 = vmatprep.subr.mxu1 %v492_v13 }
 0x344   : > { %528 = vmatpush1.msra.mxu1 %v491_v14 }
 0x345   : > { %v451_v18 = vpop.permute.xlu1 %450 }
 0x346   : > { %v453_v19 = vsel %vm452_vm5, %v449_v12, %v451_v18  ;;  %v454_v20 = vsel %vm452_vm5, %v451_v18, %v449_v12  ;;  %v288_v18 = vld [vmem:[%s1446_s4 + $0x8] sm:$0xff] }
 0x347   : > { %v489_v22 = vmul.f32 %v454_v20, %v295_v15  ;;  %v490_v23 = vmul.f32 %v453_v19, %v296_v16 }
 0x349   : > { %v442_v26 = vpop.permute.xlu1 %441  ;;  %529 = vmatprep.subr.mxu1 %v490_v23 }
 0x34a   : > { %v446_v27 = vsel %vm445_vm6, %v442_v26, %v444_v17  ;;  %v447_v28 = vsel %vm445_vm6, %v444_v17, %v442_v26  ;;  %530 = vmatpush1.msra.mxu1 %v489_v22  ;;  %v287_v17 = vld [vmem:[%s1446_s4] sm:$0xff] }
 0x34b   : > { %v487_v30 = vmul.f32 %v447_v28, %v293_v24  ;;  %v488_v31 = vmul.f32 %v446_v27, %v294_v25 }
 0x34d   : > { %v435_v34 = vpop.permute.xlu1 %434  ;;  %531 = vmatprep.subr.mxu1 %v488_v31  ;;  %v1129_v31 = vmov 4  }
 0x34e   : > { %v439_v35 = vsel %vm438_vm7, %v435_v34, %v437_v29  ;;  %v440_v37 = vsel %vm438_vm7, %v437_v29, %v435_v34  ;;  %532 = vmatpush1.msra.mxu1 %v487_v30 }
 0x34f   : > { %v485_v38 = vmul.f32 %v440_v37, %v291_v32  ;;  %v486_v39 = vmul.f32 %v439_v35, %v292_v33 }
 0x351   : > { %v426_v43 = vpop.permute.xlu1 %425  ;;  %533 = vmatprep.subr.mxu1 %v486_v39 }
 0x352   : > { %v432_v44 = vsel %vm431_vm8, %v426_v43, %v428_v42  ;;  %v433_v45 = vsel %vm431_vm8, %v428_v42, %v426_v43  ;;  %534 = vmatpush1.msra.mxu1 %v485_v38 }
 0x353   : > { %v483_v46 = vmul.f32 %v433_v45, %v289_v40  ;;  %v484_v47 = vmul.f32 %v432_v44, %v290_v41 }
 0x355   : > { %535 = vmatprep.subr.mxu1 %v484_v47  ;;  %v1130_v47 = vmov 5  }
 0x356   : > { %536 = vmatpush1.msra.mxu1 %v483_v46  ;;  %978 = vset.pattern.permute.xlu0 %v1130_v47 }
 0x357   : > { %888 = vmatmul.mubr.msk.f32.vlgmr.msra.gmra.mxu1 %vm501_vm9, %v286_v48 }
 0x417   : > { %v571_v49 = vpop.f32.mrf.mxu1 }
 0x418   : > { %v579_v52 = vmul.f32 %v571_v49, %v571_v49 }
 0x419   : > { %v573_v36 = vpop.f32.mrf.mxu1 }
 0x41a   : > { %v580_v50 = vmul.f32 %v573_v36, %v573_v36  ;;  %v576_v51 = vadd.f32 %v573_v36, %v571_v49 }
 0x41c   : > { %577 = vadd.xlane.f32.xlu1 %v576_v51  ;;  %v581_v53 = vadd.f32 %v580_v50, %v579_v52 }
 0x41e   : > { %582 = vadd.xlane.f32.xlu0 %v581_v53 }
 0x4a5   : > { %v578_v55 = vpop.xlane.xlu1 %577 }
 0x4a6   : > { %v584_v56 = vmul.f32 0.00390625, %v578_v55 }
 0x4a7   : > { %v583_v57 = vpop.xlane.xlu0 %582 }
 0x4a8   : > { %v586_v58 = vmul.f32 %v584_v56, %v584_v56  ;;  %v585_v59 = vmul.f32 0.00390625, %v583_v57 }
 0x4aa   : > { %v587_v60 = vsub.f32 %v585_v59, %v586_v58 }
 0x4ac   : > { %v588_v61 = vadd.f32 1e-05, %v587_v60 }
 0x4ae   : > { %982 = vrsqrt.f32 %v588_v61 }
 0x4bb   : > { %v983_v62 = vpop.eup %982 }
 0x4bc   : > { %v590_v63 = vmul.f32 %v983_v62, %v1325_v21 }
 0x4be   : > { %599 = vperm.xlu1 %975, %v590_v63   ;;  %v591_v5 = vmul.f32 %v590_v63, %v584_v56 }
 0x4c0   : > { %593 = vrot.lane.b32.xlu0 %v591_v5, %s1119_s15 }
 0x4c2   : > { %976 = vset.pattern.permute.xlu1 %v1128_v6 }
 0x532   : > { %v594_v7 = vpop.permute.xlu0 %593 }
 0x533   : > { %v596_v8 = vsub.f32 %v1325_v21, %v594_v7 }
 0x535   : > { %606 = vperm.xlu1 %976, %v596_v8  }
 0x539   : > { %v600_v9 = vpop.permute.xlu1 %599  ;;  %977 = vset.pattern.permute.xlu1 %v1129_v31 }
 0x53a   : > { %v602_v10 = vmul.f32 %v600_v9, %v571_v49  ;;  %v603_v11 = vmul.f32 %v600_v9, %v573_v36  ;;  %v308_v36 = vld [vmem:[%s1447_s5 + $0x8] sm:$0xff] }
 0x5b0   : > { %v607_v12 = vpop.permute.xlu1 %606 }
 0x5b1   : > { %v609_v13 = vadd.f32 %v607_v12, %v602_v10  ;;  %v610_v14 = vadd.f32 %v607_v12, %v603_v11 }
 0x5b3   : > { %v611_v15 = vmax.f32 %v609_v13, 0.0  ;;  %v612_v16 = vmax.f32 %v610_v14, 0.0 }
 0x5b5   : > { %650 = vmatprep.subr.mxu0 %v612_v16 }
 0x5b6   : > { %651 = vmatpush1.msra.mxu0 %v611_v15 }
 0x5b7   : > { %889 = vmatmul.mubr.msk.f32.vlgmr.msra.gmra.mxu0 %vm613_vm10, %v287_v17 }
 0x5b8   : > { %690 = vmatprep.mubr.f32.mxu0 %v1116_v0 }
 0x5bb   : > { %890 = vmatmul.mubr.msk.f32.gmra.mxu0 %vm613_vm10, %v288_v18 }
 0x677   : > { %v686_v19 = vpop.f32.mrf.mxu0 }
 0x678   : > { %v703_v25 = vmul.f32 %v686_v19, %v686_v19 }
 0x679   : > { %v688_v20 = vpop.f32.mrf.mxu0 }
 0x67a   : > { %v697_v22 = vadd.f32 %v688_v20, %v686_v19  ;;  %v704_v23 = vmul.f32 %v688_v20, %v688_v20 }
 0x67b   : > { %v692_v24 = vpop.f32.mrf.mxu0 }
 0x67c   : > { %698 = vadd.xlane.f32.xlu0 %v697_v22  ;;  %v707_v28 = vadd.f32 %v704_v23, %v703_v25  ;;  %v705_v30 = vmul.f32 %v692_v24, %v692_v24 }
 0x67d   : > { %v694_v26 = vpop.f32.mrf.mxu0 }
 0x67e   : > { %v706_v27 = vmul.f32 %v694_v26, %v694_v26  ;;  %v700_v29 = vadd.f32 %v694_v26, %v692_v24 }
 0x680   : > { %708 = vadd.xlane.f32.xlu0 %v707_v28  ;;  %701 = vadd.xlane.f32.xlu1 %v700_v29  ;;  %v710_v0 = vadd.f32 %v706_v27, %v705_v30 }
 0x684   : > { %711 = vadd.xlane.f32.xlu0 %v710_v0 }
 0x705   : > { %v699_v32 = vpop.xlane.xlu0 %698 }
 0x706   : > { %v713_v33 = vmul.f32 0.00390625, %v699_v32 }
 0x708   : > { %v717_v37 = vmul.f32 %v713_v33, %v713_v33 }
 0x709   : > { %v709_v34 = vpop.xlane.xlu0 %708  ;;  %v702_v35 = vpop.xlane.xlu1 %701 }
 0x70a   : > { %v715_v38 = vmul.f32 0.00390625, %v709_v34  ;;  %v714_v39 = vmul.f32 0.00390625, %v702_v35 }
 0x70c   : > { %v719_v40 = vsub.f32 %v715_v38, %v717_v37  ;;  %v718_v43 = vmul.f32 %v714_v39, %v714_v39 }
 0x70d   : > { %v712_v41 = vpop.xlane.xlu0 %711 }
 0x70e   : > { %v721_v42 = vadd.f32 1e-05, %v719_v40  ;;  %v716_v44 = vmul.f32 0.00390625, %v712_v41 }
 0x710   : > { %984 = vrsqrt.f32 %v721_v42  ;;  %v720_v45 = vsub.f32 %v716_v44, %v718_v43 }
 0x712   : > { %v722_v46 = vadd.f32 1e-05, %v720_v45 }
 0x714   : > { %986 = vrsqrt.f32 %v722_v46 }
 0x71d   : > { %v985_v48 = vpop.eup %984 }
 0x71e   : > { %v725_v49 = vmul.f32 %v985_v48, %v1325_v21 }
 0x720   : > { %v727_v50 = vmul.f32 %v725_v49, %v713_v33 }
 0x721   : > { %v987_v51 = vpop.eup %986 }
 0x722   : > { %731 = vrot.lane.b32.xlu1 %v727_v50, %s1119_s15  ;;  %v726_v52 = vmul.f32 %v987_v51, %v308_v36 }
 0x724   : > { %v728_v53 = vmul.f32 %v726_v52, %v714_v39 }
 0x726   : > { %741 = vperm.xlu1 %977, %v725_v49   ;;  %733 = vrot.lane.b32.xlu0 %v728_v53, %s1119_s15  ;;  %s284_s15 = scalar_lea.vmem [#allocation7], %s884_s14 }
 0x727   : > { %s793_s16 = sshll.u32 %s284_s15, 4  ;;  %s1393_s16 = int_to_ptr.vmem [resolvable:$true] %s793_s16 }
 0x728   : > { %s1042_s27 = scalar_lea.vmem %s1393_s16, 512  ;;  %p1049_p10 = scmp.lt.s32.totalorder %s1393_s16, %s1047_s12 }
 0x729   : > { %p1043_p3 = scmp.ne.s32.totalorder %s1393_s16, %s1042_s27  ;;  %p1050_p12 = scmp.lt.s32.totalorder %s1048_s10, %s1042_s27 }
 0x72a   : > { %746 = vperm.xlu1 %977, %v726_v52  }
 0x72b   : > { %p1044_p7 = pnand %p1043_p3, %p1468_p11  ;;  %p1051_p13 = por %p1050_p12, %p1049_p10 }
 0x72d   : > { %p1045_p9 = pneg %p1044_p7 }
 0x72e   : > { %979 = vset.pattern.permute.xlu1 %v1130_v47 }
 0x72f   : > { %p1052_p0 = pnand %p1051_p13, %p1045_p9 }
 0x794   : > { %v732_v54 = vpop.permute.xlu1 %731 }
 0x795   : > { %v737_v55 = vsub.f32 %v1325_v21, %v732_v54 }
 0x797   : > { %755 = vperm.xlu0 %978, %v737_v55  }
 0x798   : > { %v734_v56 = vpop.permute.xlu0 %733 }
 0x799   : > { %v738_v57 = vsub.f32 %v308_v36, %v734_v56 }
 0x79b   : > { %760 = vperm.xlu1 %979, %v738_v57  }
 0x7a1   : > { %v742_v58 = vpop.permute.xlu1 %741 }
 0x7a2   : > { %v749_v59 = vmul.f32 %v742_v58, %v686_v19  ;;  %v750_v60 = vmul.f32 %v742_v58, %v688_v20 }
 0x7a5   : > { %v747_v61 = vpop.permute.xlu1 %746 }
 0x7a6   : > { %v751_v6 = vmul.f32 %v747_v61, %v692_v24  ;;  %v752_v7 = vmul.f32 %v747_v61, %v694_v26 }
 0x812   : > { %v756_v62 = vpop.permute.xlu0 %755 }
 0x813   : > { %v763_v63 = vadd.f32 %v756_v62, %v749_v59  ;;  %v764_v5 = vadd.f32 %v756_v62, %v750_v60 }
 0x815   : > { %v767_v8 = vadd.f32 %v763_v63, %v1313_v4  ;;  %v768_v9 = vadd.f32 %v764_v5, %v1310_v3 }
 0x816   : > { %v761_v21 = vpop.permute.xlu1 %760 }
 0x817   : > { %v771_v10 = vmax.f32 %v767_v8, 0.0  ;;  %v772_v11 = vmax.f32 %v768_v9, 0.0  ;;  %v765_v12 = vadd.f32 %v761_v21, %v751_v6  ;;  %v766_v13 = vadd.f32 %v761_v21, %v752_v7 }
 0x819   : > { %775 = vst [vmem:[%s284_s15] sm:$0xff] %v771_v10  ;;  %776 = vst [vmem:[%s284_s15 + $0x8] sm:$0xff] %v772_v11  ;;  %v769_v14 = vadd.f32 %v765_v12, %v1308_v2  ;;  %v770_v15 = vadd.f32 %v766_v13, %v1306_v1 }
 0x81b   : > { %v773_v3 = vmax.f32 %v769_v14, 0.0  ;;  %v774_v4 = vmax.f32 %v770_v15, 0.0 }
 0x81d   : > { %777 = vst [vmem:[%s284_s15 + $0x10] sm:$0xff] %v773_v3  ;;  %778 = vst [vmem:[%s284_s15 + $0x18] sm:$0xff] %v774_v4 }
 0x81e   : > { %1055 = shalt.err (!%p1052_p0)
}
 0x81f   : > { %s1056_s8 = scalar_lea.hbm %s1398_s11, 512  ;;  %s1060_s15 = scalar_lea.hbm %s1448_s6, 1024 }
 0x820   : > { %p1057_p5 = scmp.ne.s32.totalorder %s1398_s11, %s1056_s8  ;;  %p1061_p4 = scmp.lt.s32.totalorder %s1398_s11, %s1448_s6 }
 0x821   : > { %p1062_p6 = scmp.lt.s32.totalorder %s1060_s15, %s1056_s8 }
 0x822   : > { %p1058_p2 = pnand %p1057_p5, %p1468_p11 }
 0x823   : > { %p1063_p8 = por %p1062_p6, %p1061_p4 }
 0x824   : > { %p1059_p1 = pneg %p1058_p2 }
 0x826   : > { %p1064_p3 = pnand %p1063_p8, %p1059_p1 }
 0x828   : > { %1067 = shalt.err (!%p1064_p3)
}
 0x829   : > { %s1132_s26 = smov 256  }
 0x82a   : > { %904 = dma.vmem_to_hbm [thread:$0]  (%p1468_p11), %s1393_s16, 512, %s1398_s11, %s780_s25, %s1132_s26, %s1132_s26, %s1122_s19  }
 0x82b PF: > { %s808_s27 = sand.u32 1, %s1098_s21   ;;  %p1469_p7 = scmp.ne.s32.totalorder %s1456_s28, 0 }
 0x82c   : > { %p1470_p9 = scmp.ge.s32.totalorder %s1110_s24, 2  ;;  %s809_s29 = scalar_lea.sflag [#allocation4], %s808_s27 }
 0x82e   : > { %p915_p10 = pnand %p1470_p9, %p1469_p7 }
 0x830   : > { %p916_p12 = pneg %p915_p10 }
 0x832   : > { %1093 = dma.done.wait (%p916_p12), %s809_s29, 512  }
 0x833   : > { %1095 = vsyncadd (%p916_p12), %s809_s29, 4294966784  ;;  %p20_p13 = scmp.ge.s32.totalorder %s1222_s9, 4   ;;  %s1471_s21 = smov %s1102_s22 }
 0x834   : > { %s1472_s22 = smov %s1106_s23  ;;  %s1473_s23 = smov %s1242_s17 }
 0x835   : > { %s1474_s24 = smov %s1222_s9  ;;  %22 = sbr.rel (!%p20_p13) target bundleno = 6 (0x6), region = 93 }
 0x83a   :  { %814 = vsyncpa [#allocation3], 1 }
 0x83b   :  { %816 = vsyncpa [#allocation3 + $0x1], 1 }
 0x83c   :  { %817 = vsyncpa [#allocation6], 1 }
 0x83d   :  { %818 = vsyncpa [#allocation4], 1 }
 0x83e   :  { %820 = vsyncpa [#allocation4 + $0x1], 1 }

</bundles_post_ra>
